<compile_context>
chip_gen: v5e
topology: v5e:2x2
jax: 0.10.0
libtpu: 0.0.40
codegen_flags: <defaults>
</compile_context>

<pallas_src>
import functools

import jax
import jax.numpy as jnp
from jax.experimental import pallas as pl
from jax.experimental.pallas import tpu as pltpu


def _round_up(x, m):
    return ((x + m - 1) // m) * m


def _make_value_net_kernel(use_reduce_head, compute_dtype):
    def kernel(x_ref, w1_ref, b1_ref, w2_ref, b2_ref, w3_ref, b3_ref, o_ref):
        # x arrives as f32 straight from HBM; one VPU cast per tile feeds the MXU.
        x = x_ref[...].astype(compute_dtype)

        # fc1 + ReLU (MXU in compute_dtype, f32 accumulate; bias/ReLU in f32).
        h1 = jnp.dot(x, w1_ref[...], preferred_element_type=jnp.float32)
        h1 = jnp.maximum(h1 + b1_ref[...], 0.0)

        # fc2 + ReLU.
        h2 = jnp.dot(h1.astype(w2_ref.dtype), w2_ref[...],
                     preferred_element_type=jnp.float32)
        h2 = jnp.maximum(h2 + b2_ref[...], 0.0)

        if use_reduce_head:
            # output_size == 1: VPU multiply + lane reduce; w3_ref is (1, hidden) f32.
            out = jnp.sum(h2 * w3_ref[...], axis=-1, keepdims=True)
        else:
            out = jnp.dot(h2.astype(w3_ref.dtype), w3_ref[...],
                          preferred_element_type=jnp.float32)

        # TODO(synk): out last-dim == 1 produces masked partial stores (vst.msk);
        # left as-is since output bytes << input bytes (only fix if a bundle
        # dump shows it on the critical path).
        o_ref[...] = (out + b3_ref[...]).astype(o_ref.dtype)

    return kernel


@functools.partial(
    jax.jit,
    static_argnames=("tb", "b_pad", "use_reduce_head", "compute_dtype",
                     "vmem_limit", "single_buffer_weights"))
def _value_net_call(x, w1, b1, w2, b2, w3, b3, *, tb, b_pad, use_reduce_head,
                    compute_dtype, vmem_limit, single_buffer_weights):
    B, in_size = x.shape
    out_size = b3.shape[1]

    if b_pad != B:
        x = jnp.pad(x, ((0, b_pad - B), (0, 0)))

    if single_buffer_weights:
        # Constant index_map -> keep weights/biases single-buffered in VMEM.
        resident = lambda a: pl.BlockSpec(a.shape, lambda i: (0,) * a.ndim,
                                          pipeline_mode=pl.Buffered(1))
    else:
        resident = lambda a: pl.BlockSpec(a.shape, lambda i: (0,) * a.ndim)

    out = pl.pallas_call(
        _make_value_net_kernel(use_reduce_head, compute_dtype),
        out_shape=jax.ShapeDtypeStruct((b_pad, out_size), jnp.float32),
        grid_spec=pltpu.PrefetchScalarGridSpec(
            num_scalar_prefetch=0,
            grid=(b_pad // tb,),
            in_specs=[
                pl.BlockSpec((tb, in_size), lambda i: (i, 0)),   # x walks the batch
                resident(w1), resident(b1),                      # weights stay put
                resident(w2), resident(b2),
                resident(w3), resident(b3),
            ],
            out_specs=pl.BlockSpec((tb, out_size), lambda i: (i, 0)),
        ),
        compiler_params=pltpu.CompilerParams(
            dimension_semantics=("parallel",),   # shard batch across TCs (v7x)
            vmem_limit_bytes=vmem_limit,
        ),
    )(x, w1, b1, w2, b2, w3, b3)
    return out[:B]


def prepare_params(params, *, compute_dtype=jnp.bfloat16):
    """One-time weight cast/layout (hoisted out of the per-call jitted path).

    Weights are [in_features, out_features] (PyTorch W transposed), so the kernel
    computes y = x @ W + b.  For output_size == 1, w3 is stored as an f32 row
    (1, hidden) for the VPU reduce head.
    """
    out_size = params["w3"].shape[1]
    prep = {
        "w1": params["w1"].astype(compute_dtype),
        "b1": params["b1"].reshape(1, -1).astype(jnp.float32),
        "w2": params["w2"].astype(compute_dtype),
        "b2": params["b2"].reshape(1, -1).astype(jnp.float32),
        "b3": params["b3"].reshape(1, -1).astype(jnp.float32),
    }
    if out_size == 1:
        prep["w3"] = params["w3"].T.astype(jnp.float32)    # (1, hidden) f32 row
    else:
        prep["w3"] = params["w3"].astype(compute_dtype)    # (hidden, out) MXU path
    return prep


def value_network_forward(x, prep, *, tile_b=2048, compute_dtype=jnp.bfloat16):
    """x: [B, input_size] float32.  prep: output of prepare_params()."""
    B, in_size = x.shape
    hidden = prep["w2"].shape[1]
    out_size = prep["b3"].shape[1]
    use_reduce_head = (out_size == 1 and prep["w3"].shape == (1, hidden))

    # Generation-aware VMEM budget (v5e/v6e: 128 MiB physical, v7x: 64 MiB).
    try:
        vmem_cap = int(pltpu.get_tpu_info().vmem_capacity_bytes)
    except Exception:
        vmem_cap = 64 * 1024 * 1024
    vmem_limit = int(vmem_cap * 7 // 8)

    w_bytes = sum(int(prep[k].size) * prep[k].dtype.itemsize
                  for k in ("w1", "w2", "w3", "b1", "b2", "b3"))

    def vmem_needed(tb):
        x_bytes = 2 * tb * in_size * x.dtype.itemsize      # double-buffered input
        o_bytes = 2 * tb * out_size * 4                    # double-buffered output
        act_bytes = 2 * tb * hidden * 4                    # h1/h2 f32 live ranges
        return x_bytes + o_bytes + act_bytes + 2 * w_bytes  # 2x weights: worst case

    # Batch tile: multiple of 16 (bf16 (16,128) native tiling), sized to fit VMEM.
    TB = min(_round_up(tile_b, 16), _round_up(B, 16))
    while TB > 16 and vmem_needed(TB) > vmem_limit:
        TB = _round_up(TB // 2, 16)

    # Bound padding waste (< ~12.5%) for batches just above a tile multiple.
    while TB > 16 and (_round_up(B, TB) - B) * 8 > B:
        TB = _round_up(TB // 2, 16)

    B_pad = _round_up(B, TB)

    # Give the v7x megacore at least 2 grid steps to shard across TensorCores.
    if B_pad // TB == 1 and B_pad >= 256:
        TB = max(128, _round_up((B_pad + 1) // 2, 16))
        B_pad = _round_up(B, TB)

    kwargs = dict(tb=TB, b_pad=B_pad, use_reduce_head=use_reduce_head,
                  compute_dtype=compute_dtype, vmem_limit=vmem_limit)
    args = (x, prep["w1"], prep["b1"], prep["w2"], prep["b2"],
            prep["w3"], prep["b3"])
    try:
        return _value_net_call(*args, single_buffer_weights=True, **kwargs)
    except Exception:
        # Fallback if this runtime rejects pl.Buffered(1) single-buffering.
        return _value_net_call(*args, single_buffer_weights=False, **kwargs)


def init_params(key, input_size, hidden_size, output_size):
    """Deterministic synthetic init (same shapes as nn.Linear, stored transposed)."""
    k1, k2, k3, k4, k5, k6 = jax.random.split(key, 6)

    def linear(kw, kb, fan_in, fan_out):
        bound = 1.0 / jnp.sqrt(fan_in)
        w = jax.random.uniform(kw, (fan_in, fan_out), jnp.float32, -bound, bound)
        b = jax.random.uniform(kb, (1, fan_out), jnp.float32, -bound, bound)
        return w, b

    w1, b1 = linear(k1, k2, input_size, hidden_size)
    w2, b2 = linear(k3, k4, hidden_size, hidden_size)
    w3, b3 = linear(k5, k6, hidden_size, output_size)
    return {"w1": w1, "b1": b1, "w2": w2, "b2": b2, "w3": w3, "b3": b3}


def reference_forward(x, params, compute_dtype=jnp.bfloat16):
    """Pure-JAX reference mirroring the kernel's bf16-input / f32-accumulate math."""
    f32 = jnp.float32
    hi = jax.lax.Precision.HIGHEST
    q = lambda a: a.astype(compute_dtype).astype(f32)
    mm = lambda a, b: jnp.dot(a, b, precision=hi)
    h1 = jnp.maximum(mm(q(x), q(params["w1"])) + params["b1"], 0.0)
    h2 = jnp.maximum(mm(q(h1), q(params["w2"])) + params["b2"], 0.0)
    if params["w3"].shape[1] == 1:
        return mm(h2, params["w3"].astype(f32)) + params["b3"]
    return mm(q(h2), q(params["w3"])) + params["b3"]


if __name__ == "__main__":
    key = jax.random.PRNGKey(0)
    k_params, k_x, k_x2 = jax.random.split(key, 3)

    batch, input_size, hidden_size, output_size = 8, 16, 32, 1
    params = init_params(k_params, input_size, hidden_size, output_size)
    prep = prepare_params(params)                      # one-time weight cast

    # Test 1: small batch, single tile.
    x = jax.random.normal(k_x, (batch, input_size), jnp.float32)
    out = value_network_forward(x, prep)
    jax.block_until_ready(out)
    ref = reference_forward(x, params)
    assert out.shape == (batch, output_size)
    assert jnp.allclose(out, ref, atol=1e-3, rtol=1e-3), (
        f"max abs err {jnp.max(jnp.abs(out - ref))}")

    # Test 2: multi-tile grid with a padded final tile.
    batch2 = 272
    x2 = jax.random.normal(k_x2, (batch2, input_size), jnp.float32)
    out2 = value_network_forward(x2, prep, tile_b=64)
    jax.block_until_ready(out2)
    ref2 = reference_forward(x2, params)
    assert out2.shape == (batch2, output_size)
    assert jnp.allclose(out2, ref2, atol=1e-3, rtol=1e-3), (
        f"max abs err {jnp.max(jnp.abs(out2 - ref2))}")

    print("KERNEL_OK")
</pallas_src>

<mosaic_0001>
module attributes {stable_mosaic.version = 11 : i64} {
  func.func @kernel(%arg0: i32, %arg1: memref<16x16xf32, #tpu.memory_space<vmem>>, %arg2: memref<16x32xbf16, #tpu.memory_space<vmem>>, %arg3: memref<1x32xf32, #tpu.memory_space<vmem>>, %arg4: memref<32x32xbf16, #tpu.memory_space<vmem>>, %arg5: memref<1x32xf32, #tpu.memory_space<vmem>>, %arg6: memref<1x32xf32, #tpu.memory_space<vmem>>, %arg7: memref<1x1xf32, #tpu.memory_space<vmem>>, %arg8: memref<16x1xf32, #tpu.memory_space<vmem>>) attributes {dimension_semantics = [#tpu.dimension_semantics<parallel>], iteration_bounds = array<i64: 1>, scalar_prefetch = 0 : i64, scratch_operands = 0 : i64, tpu.core_type = #tpu.core_type<tc>, window_params = [{transform_indices = @transform_0, window_bounds = array<i64: 16, 16>}, {pipeline_mode = #tpu.pipeline_mode<synchronous>, transform_indices = @transform_1, window_bounds = array<i64: 16, 32>}, {pipeline_mode = #tpu.pipeline_mode<synchronous>, transform_indices = @transform_2, window_bounds = array<i64: 1, 32>}, {pipeline_mode = #tpu.pipeline_mode<synchronous>, transform_indices = @transform_3, window_bounds = array<i64: 32, 32>}, {pipeline_mode = #tpu.pipeline_mode<synchronous>, transform_indices = @transform_4, window_bounds = array<i64: 1, 32>}, {pipeline_mode = #tpu.pipeline_mode<synchronous>, transform_indices = @transform_5, window_bounds = array<i64: 1, 32>}, {pipeline_mode = #tpu.pipeline_mode<synchronous>, transform_indices = @transform_6, window_bounds = array<i64: 1, 1>}, {transform_indices = @transform_7, window_bounds = array<i64: 16, 1>}]} {
    %c0 = arith.constant 0 : index
    %c0_0 = arith.constant 0 : index
    %0 = vector.load %arg1[%c0, %c0_0] : memref<16x16xf32, #tpu.memory_space<vmem>>, vector<16x16xf32>
    %1 = arith.truncf %0 : vector<16x16xf32> to vector<16x16xbf16>
    %c0_1 = arith.constant 0 : index
    %c0_2 = arith.constant 0 : index
    %2 = vector.load %arg2[%c0_1, %c0_2] : memref<16x32xbf16, #tpu.memory_space<vmem>>, vector<16x32xbf16>
    %cst = arith.constant dense<0.000000e+00> : vector<16x32xf32>
    %3 = tpu.matmul %1, %2, %cst {dimension_numbers = #tpu.dot_dimension_numbers<[1], [0], [0], [1], [0, 0, 1, 1], [], []>} : vector<16x16xbf16>, vector<16x32xbf16>, vector<16x32xf32> -> vector<16x32xf32>
    %c0_3 = arith.constant 0 : index
    %c0_4 = arith.constant 0 : index
    %4 = vector.load %arg3[%c0_3, %c0_4] : memref<1x32xf32, #tpu.memory_space<vmem>>, vector<1x32xf32>
    %5 = vector.broadcast %4 : vector<1x32xf32> to vector<16x32xf32>
    %6 = arith.addf %3, %5 : vector<16x32xf32>
    %cst_5 = arith.constant 0.000000e+00 : f32
    %7 = vector.broadcast %cst_5 : f32 to vector<16x32xf32>
    %8 = arith.maximumf %6, %7 : vector<16x32xf32>
    %9 = arith.truncf %8 : vector<16x32xf32> to vector<16x32xbf16>
    %c0_6 = arith.constant 0 : index
    %c0_7 = arith.constant 0 : index
    %10 = vector.load %arg4[%c0_6, %c0_7] : memref<32x32xbf16, #tpu.memory_space<vmem>>, vector<32x32xbf16>
    %cst_8 = arith.constant dense<0.000000e+00> : vector<16x32xf32>
    %11 = tpu.matmul %9, %10, %cst_8 {dimension_numbers = #tpu.dot_dimension_numbers<[1], [0], [0], [1], [0, 0, 1, 1], [], []>} : vector<16x32xbf16>, vector<32x32xbf16>, vector<16x32xf32> -> vector<16x32xf32>
    %c0_9 = arith.constant 0 : index
    %c0_10 = arith.constant 0 : index
    %12 = vector.load %arg5[%c0_9, %c0_10] : memref<1x32xf32, #tpu.memory_space<vmem>>, vector<1x32xf32>
    %13 = vector.broadcast %12 : vector<1x32xf32> to vector<16x32xf32>
    %14 = arith.addf %11, %13 : vector<16x32xf32>
    %cst_11 = arith.constant 0.000000e+00 : f32
    %15 = vector.broadcast %cst_11 : f32 to vector<16x32xf32>
    %16 = arith.maximumf %14, %15 : vector<16x32xf32>
    %c0_12 = arith.constant 0 : index
    %c0_13 = arith.constant 0 : index
    %17 = vector.load %arg6[%c0_12, %c0_13] : memref<1x32xf32, #tpu.memory_space<vmem>>, vector<1x32xf32>
    %18 = vector.broadcast %17 : vector<1x32xf32> to vector<16x32xf32>
    %19 = arith.mulf %16, %18 : vector<16x32xf32>
    %cst_14 = arith.constant dense<0.000000e+00> : vector<16xf32>
    %20 = vector.multi_reduction <add>, %19, %cst_14 [1] : vector<16x32xf32> to vector<16xf32>
    %21 = vector.shape_cast %20 : vector<16xf32> to vector<16x1xf32>
    %c0_15 = arith.constant 0 : index
    %c0_16 = arith.constant 0 : index
    %22 = vector.load %arg7[%c0_15, %c0_16] : memref<1x1xf32, #tpu.memory_space<vmem>>, vector<1x1xf32>
    %23 = vector.broadcast %22 : vector<1x1xf32> to vector<16x1xf32>
    %24 = arith.addf %21, %23 : vector<16x1xf32>
    %c0_17 = arith.constant 0 : index
    %c0_18 = arith.constant 0 : index
    %25 = vector.load %arg8[%c0_17, %c0_18] : memref<16x1xf32, #tpu.memory_space<vmem>>, vector<16x1xf32>
    tpu.vector_store %arg8[%c0_17, %c0_18], %24 {strides = array<i32>} : memref<16x1xf32, #tpu.memory_space<vmem>>, vector<16x1xf32>,
    return
  }
  func.func @transform_0(%arg0: i32) -> (i32, i32) {
    %c0_i32 = arith.constant 0 : i32
    %c0_i32_0 = arith.constant 0 : i32
    return %arg0, %c0_i32 : i32, i32
  }
  func.func @transform_1(%arg0: i32) -> (i32, i32) {
    %c0_i32 = arith.constant 0 : i32
    %c0_i32_0 = arith.constant 0 : i32
    %c0_i32_1 = arith.constant 0 : i32
    return %c0_i32, %c0_i32_0 : i32, i32
  }
  func.func @transform_2(%arg0: i32) -> (i32, i32) {
    %c0_i32 = arith.constant 0 : i32
    %c0_i32_0 = arith.constant 0 : i32
    %c0_i32_1 = arith.constant 0 : i32
    return %c0_i32, %c0_i32_0 : i32, i32
  }
  func.func @transform_3(%arg0: i32) -> (i32, i32) {
    %c0_i32 = arith.constant 0 : i32
    %c0_i32_0 = arith.constant 0 : i32
    %c0_i32_1 = arith.constant 0 : i32
    return %c0_i32, %c0_i32_0 : i32, i32
  }
  func.func @transform_4(%arg0: i32) -> (i32, i32) {
    %c0_i32 = arith.constant 0 : i32
    %c0_i32_0 = arith.constant 0 : i32
    %c0_i32_1 = arith.constant 0 : i32
    return %c0_i32, %c0_i32_0 : i32, i32
  }
  func.func @transform_5(%arg0: i32) -> (i32, i32) {
    %c0_i32 = arith.constant 0 : i32
    %c0_i32_0 = arith.constant 0 : i32
    %c0_i32_1 = arith.constant 0 : i32
    return %c0_i32, %c0_i32_0 : i32, i32
  }
  func.func @transform_6(%arg0: i32) -> (i32, i32) {
    %c0_i32 = arith.constant 0 : i32
    %c0_i32_0 = arith.constant 0 : i32
    %c0_i32_1 = arith.constant 0 : i32
    return %c0_i32, %c0_i32_0 : i32, i32
  }
  func.func @transform_7(%arg0: i32) -> (i32, i32) {
    %c0_i32 = arith.constant 0 : i32
    %c0_i32_0 = arith.constant 0 : i32
    return %arg0, %c0_i32 : i32, i32
  }
}

module attributes {stable_mosaic.version = 11 : i64} {
  func.func @kernel(%arg0: i32, %arg1: memref<16x16xf32, #tpu.memory_space<vmem>>, %arg2: memref<16x32xbf16, #tpu.memory_space<vmem>>, %arg3: memref<1x32xf32, #tpu.memory_space<vmem>>, %arg4: memref<32x32xbf16, #tpu.memory_space<vmem>>, %arg5: memref<1x32xf32, #tpu.memory_space<vmem>>, %arg6: memref<1x32xf32, #tpu.memory_space<vmem>>, %arg7: memref<1x1xf32, #tpu.memory_space<vmem>>, %arg8: memref<16x1xf32, #tpu.memory_space<vmem>>) attributes {dimension_semantics = [#tpu.dimension_semantics<parallel>], iteration_bounds = array<i64: 1>, scalar_prefetch = 0 : i64, scratch_operands = 0 : i64, tpu.core_type = #tpu.core_type<tc>, window_params = [{transform_indices = @transform_0, window_bounds = array<i64: 16, 16>}, {pipeline_mode = #tpu.pipeline_mode<synchronous>, transform_indices = @transform_1, window_bounds = array<i64: 16, 32>}, {pipeline_mode = #tpu.pipeline_mode<synchronous>, transform_indices = @transform_2, window_bounds = array<i64: 1, 32>}, {pipeline_mode = #tpu.pipeline_mode<synchronous>, transform_indices = @transform_3, window_bounds = array<i64: 32, 32>}, {pipeline_mode = #tpu.pipeline_mode<synchronous>, transform_indices = @transform_4, window_bounds = array<i64: 1, 32>}, {pipeline_mode = #tpu.pipeline_mode<synchronous>, transform_indices = @transform_5, window_bounds = array<i64: 1, 32>}, {pipeline_mode = #tpu.pipeline_mode<synchronous>, transform_indices = @transform_6, window_bounds = array<i64: 1, 1>}, {transform_indices = @transform_7, window_bounds = array<i64: 16, 1>}]} {
    %c0 = arith.constant 0 : index
    %c0_0 = arith.constant 0 : index
    %0 = vector.load %arg1[%c0, %c0_0] : memref<16x16xf32, #tpu.memory_space<vmem>>, vector<16x16xf32>
    %1 = arith.truncf %0 : vector<16x16xf32> to vector<16x16xbf16>
    %c0_1 = arith.constant 0 : index
    %c0_2 = arith.constant 0 : index
    %2 = vector.load %arg2[%c0_1, %c0_2] : memref<16x32xbf16, #tpu.memory_space<vmem>>, vector<16x32xbf16>
    %cst = arith.constant dense<0.000000e+00> : vector<16x32xf32>
    %3 = tpu.matmul %1, %2, %cst {dimension_numbers = #tpu.dot_dimension_numbers<[1], [0], [0], [1], [0, 0, 1, 1], [], []>} : vector<16x16xbf16>, vector<16x32xbf16>, vector<16x32xf32> -> vector<16x32xf32>
    %c0_3 = arith.constant 0 : index
    %c0_4 = arith.constant 0 : index
    %4 = vector.load %arg3[%c0_3, %c0_4] : memref<1x32xf32, #tpu.memory_space<vmem>>, vector<1x32xf32>
    %5 = vector.broadcast %4 : vector<1x32xf32> to vector<16x32xf32>
    %6 = arith.addf %3, %5 : vector<16x32xf32>
    %cst_5 = arith.constant 0.000000e+00 : f32
    %7 = vector.broadcast %cst_5 : f32 to vector<16x32xf32>
    %8 = arith.maximumf %6, %7 : vector<16x32xf32>
    %9 = arith.truncf %8 : vector<16x32xf32> to vector<16x32xbf16>
    %c0_6 = arith.constant 0 : index
    %c0_7 = arith.constant 0 : index
    %10 = vector.load %arg4[%c0_6, %c0_7] : memref<32x32xbf16, #tpu.memory_space<vmem>>, vector<32x32xbf16>
    %cst_8 = arith.constant dense<0.000000e+00> : vector<16x32xf32>
    %11 = tpu.matmul %9, %10, %cst_8 {dimension_numbers = #tpu.dot_dimension_numbers<[1], [0], [0], [1], [0, 0, 1, 1], [], []>} : vector<16x32xbf16>, vector<32x32xbf16>, vector<16x32xf32> -> vector<16x32xf32>
    %c0_9 = arith.constant 0 : index
    %c0_10 = arith.constant 0 : index
    %12 = vector.load %arg5[%c0_9, %c0_10] : memref<1x32xf32, #tpu.memory_space<vmem>>, vector<1x32xf32>
    %13 = vector.broadcast %12 : vector<1x32xf32> to vector<16x32xf32>
    %14 = arith.addf %11, %13 : vector<16x32xf32>
    %cst_11 = arith.constant 0.000000e+00 : f32
    %15 = vector.broadcast %cst_11 : f32 to vector<16x32xf32>
    %16 = arith.maximumf %14, %15 : vector<16x32xf32>
    %c0_12 = arith.constant 0 : index
    %c0_13 = arith.constant 0 : index
    %17 = vector.load %arg6[%c0_12, %c0_13] : memref<1x32xf32, #tpu.memory_space<vmem>>, vector<1x32xf32>
    %18 = vector.broadcast %17 : vector<1x32xf32> to vector<16x32xf32>
    %19 = arith.mulf %16, %18 : vector<16x32xf32>
    %cst_14 = arith.constant dense<0.000000e+00> : vector<16xf32>
    %20 = vector.multi_reduction <add>, %19, %cst_14 [1] : vector<16x32xf32> to vector<16xf32>
    %21 = vector.shape_cast %20 : vector<16xf32> to vector<16x1xf32>
    %c0_15 = arith.constant 0 : index
    %c0_16 = arith.constant 0 : index
    %22 = vector.load %arg7[%c0_15, %c0_16] : memref<1x1xf32, #tpu.memory_space<vmem>>, vector<1x1xf32>
    %23 = vector.broadcast %22 : vector<1x1xf32> to vector<16x1xf32>
    %24 = arith.addf %21, %23 : vector<16x1xf32>
    %c0_17 = arith.constant 0 : index
    %c0_18 = arith.constant 0 : index
    %25 = vector.load %arg8[%c0_17, %c0_18] : memref<16x1xf32, #tpu.memory_space<vmem>>, vector<16x1xf32>
    tpu.vector_store %arg8[%c0_17, %c0_18], %24 {strides = array<i32>} : memref<16x1xf32, #tpu.memory_space<vmem>>, vector<16x1xf32>,
    return
  }
  func.func @transform_0(%arg0: i32) -> (i32, i32) {
    %c0_i32 = arith.constant 0 : i32
    %c0_i32_0 = arith.constant 0 : i32
    return %arg0, %c0_i32 : i32, i32
  }
  func.func @transform_1(%arg0: i32) -> (i32, i32) {
    %c0_i32 = arith.constant 0 : i32
    %c0_i32_0 = arith.constant 0 : i32
    %c0_i32_1 = arith.constant 0 : i32
    return %c0_i32, %c0_i32_0 : i32, i32
  }
  func.func @transform_2(%arg0: i32) -> (i32, i32) {
    %c0_i32 = arith.constant 0 : i32
    %c0_i32_0 = arith.constant 0 : i32
    %c0_i32_1 = arith.constant 0 : i32
    return %c0_i32, %c0_i32_0 : i32, i32
  }
  func.func @transform_3(%arg0: i32) -> (i32, i32) {
    %c0_i32 = arith.constant 0 : i32
    %c0_i32_0 = arith.constant 0 : i32
    %c0_i32_1 = arith.constant 0 : i32
    return %c0_i32, %c0_i32_0 : i32, i32
  }
  func.func @transform_4(%arg0: i32) -> (i32, i32) {
    %c0_i32 = arith.constant 0 : i32
    %c0_i32_0 = arith.constant 0 : i32
    %c0_i32_1 = arith.constant 0 : i32
    return %c0_i32, %c0_i32_0 : i32, i32
  }
  func.func @transform_5(%arg0: i32) -> (i32, i32) {
    %c0_i32 = arith.constant 0 : i32
    %c0_i32_0 = arith.constant 0 : i32
    %c0_i32_1 = arith.constant 0 : i32
    return %c0_i32, %c0_i32_0 : i32, i32
  }
  func.func @transform_6(%arg0: i32) -> (i32, i32) {
    %c0_i32 = arith.constant 0 : i32
    %c0_i32_0 = arith.constant 0 : i32
    %c0_i32_1 = arith.constant 0 : i32
    return %c0_i32, %c0_i32_0 : i32, i32
  }
  func.func @transform_7(%arg0: i32) -> (i32, i32) {
    %c0_i32 = arith.constant 0 : i32
    %c0_i32_0 = arith.constant 0 : i32
    return %arg0, %c0_i32 : i32, i32
  }
}

</mosaic_0001>

<bundles_post_ra>
// kernel: _value_net_call.1
= control target key start
LH: loop header
LB: loop body
LE: loop exit
PB: predicated region body
PF: predicated region fallthrough
CT: control target
= control target key end

     0   :  { %vm44_vm0 = vcmask 130048   ;;  %vm85_vm1 = vcmask 261120   ;;  %vm123_vm2 = vcmask 7168   ;;  %s227_s1 = inlined_call_operand.vmem [shape: bf16[16,32], index: 1, kind: input, shape index: {}]   ;;  %s228_s0 = inlined_call_operand.vmem [shape: f32[16,16], index: 0, kind: input, shape index: {}]   ;;  %s229_s2 = inlined_call_operand.vmem [shape: f32[1,32], index: 2, kind: input, shape index: {}]   ;;  %s230_s4 = inlined_call_operand.vmem [shape: f32[1,32], index: 4, kind: input, shape index: {}]   ;;  %s231_s3 = inlined_call_operand.vmem [shape: bf16[32,32], index: 3, kind: input, shape index: {}]   ;;  %s232_s5 = inlined_call_operand.vmem [shape: f32[1,32], index: 5, kind: input, shape index: {}]   ;;  %s233_s6 = inlined_call_operand.<no memory space> [shape: f32[1,1], index: 6, kind: input, shape index: {}]   ;;  %s234_s7 = inlined_call_operand.vmem [shape: f32[16,1], index: 7, kind: output, shape index: {}]  }
   0x1   :  { %v144_v0 = vld [vmem:[%s227_s1] sm:$0xff]  ;;  %v30_v2 = vld [vmem:[%s228_s0 + $0x8] sm:$0xff]  ;;  %v12_v14 = vstv %s233_s6 }
   0x2   :  { %v29_v1 = vld [vmem:[%s228_s0] sm:$0xff]  ;;  %55 = vmatpush.bf16.msra.mxu0 %v144_v0  ;;  %v146_v4 = vld [vmem:[%s231_s3 + $0x8] sm:$0xff]  ;;  %13 = vst [vmem:[#allocation2] sm:$0x1] %v12_v14 }
   0x3   :  { %v31_v3 = vpack.c.bf16 %v30_v2, %v29_v1  ;;  %95 = vmatpush.bf16.msra.mxu1 %v146_v4  ;;  %v145_v5 = vld [vmem:[%s231_s3] sm:$0xff] }
   0x4   :  { %v147_v7 = vld [vmem:[%s229_s2] ss:$0 sm:$0xff] }
   0x5   :  { %134 = vmatmul.msk.bf16.vlgmr.msra.gmra.mxu0 %vm44_vm0, %v31_v3  ;;  %v148_v15 = vld [vmem:[%s230_s4] ss:$0 sm:$0xff] }
   0x6   :  { %v149_v18 = vld [vmem:[%s232_s5] ss:$0 sm:$0xff] }
   0x7   :  { %96 = vmatpush.bf16.msra.mxu1 %v145_v5 }
   0x9   :  { %v150_v27 = vld [vmem:[#allocation2] ss:$0 sm:$0xff] }
  0x82   :  { %v57_v6 = vpop.f32.mrf.mxu0 }
  0x83   :  { %v58_v8 = vadd.f32 %v147_v7, %v57_v6 }
  0x85   :  { %v62_v11 = vmax.f32 %v58_v8, 0.0 }
  0x8a   :  { %v59_v9 = vpop.f32.mrf.mxu0 }
  0x8b   :  { %v60_v10 = vadd.f32 %v147_v7, %v59_v9 }
  0x8d   :  { %v63_v12 = vmax.f32 %v60_v10, 0.0 }
  0x8f   :  { %v64_v13 = vpack.c.bf16 %v63_v12, %v62_v11 }
  0x91   :  { %143 = vmatmul.msk.bf16.vlgmr.msra.gmra.mxu1 %vm85_vm1, %v64_v13 }
 0x10e   :  { %v98_v16 = vpop.f32.mrf.mxu1 }
 0x10f   :  { %v99_v17 = vadd.f32 %v148_v15, %v98_v16 }
 0x111   :  { %v103_v19 = vmax.f32 %v99_v17, 0.0 }
 0x113   :  { %v109_v20 = vmul.f32 %v149_v18, %v103_v19 }
 0x115   :  { %v111_v21 = vsel %vm85_vm1, %v109_v20, 0.0 }
 0x116   :  { %v100_v22 = vpop.f32.mrf.mxu1  ;;  %112 = vadd.xlane.f32.xlu0 %v111_v21 }
 0x117   :  { %v101_v23 = vadd.f32 %v148_v15, %v100_v22 }
 0x119   :  { %v104_v24 = vmax.f32 %v101_v23, 0.0 }
 0x11b   :  { %v110_v25 = vmul.f32 %v149_v18, %v104_v24 }
 0x11d   :  { %v114_v26 = vsel %vm85_vm1, %v110_v25, 0.0 }
 0x11e   :  { %115 = vadd.xlane.f32.xlu0 %v114_v26 }
 0x189   :  { %v113_v28 = vpop.xlane.xlu0 %112 }
 0x18a   :  { %v121_v29 = vadd.f32 %v150_v27, %v113_v28 }
 0x18c   :  { %124 = vst.msk [vmem:[%s234_s7] sm:$0xff] %vm123_vm2, %v121_v29 }
 0x191   :  { %v116_v30 = vpop.xlane.xlu0 %115 }
 0x192   :  { %v122_v31 = vadd.f32 %v150_v27, %v116_v30 }
 0x194   :  { %125 = vst.msk [vmem:[%s234_s7 + $0x8] sm:$0xff] %vm123_vm2, %v122_v31 }

// kernel: _value_net_call.1
= control target key start
LH: loop header
LB: loop body
LE: loop exit
PB: predicated region body
PF: predicated region fallthrough
CT: control target
= control target key end

     0   :  { %vm44_vm0 = vcmask 130048   ;;  %vm85_vm1 = vcmask 261120   ;;  %vm123_vm2 = vcmask 7168   ;;  %s227_s1 = inlined_call_operand.vmem [shape: bf16[16,32], index: 1, kind: input, shape index: {}]   ;;  %s228_s0 = inlined_call_operand.vmem [shape: f32[16,16], index: 0, kind: input, shape index: {}]   ;;  %s229_s2 = inlined_call_operand.vmem [shape: f32[1,32], index: 2, kind: input, shape index: {}]   ;;  %s230_s4 = inlined_call_operand.vmem [shape: f32[1,32], index: 4, kind: input, shape index: {}]   ;;  %s231_s3 = inlined_call_operand.vmem [shape: bf16[32,32], index: 3, kind: input, shape index: {}]   ;;  %s232_s5 = inlined_call_operand.vmem [shape: f32[1,32], index: 5, kind: input, shape index: {}]   ;;  %s233_s6 = inlined_call_operand.<no memory space> [shape: f32[1,1], index: 6, kind: input, shape index: {}]   ;;  %s234_s7 = inlined_call_operand.vmem [shape: f32[16,1], index: 7, kind: output, shape index: {}]  }
   0x1   :  { %v144_v0 = vld [vmem:[%s227_s1] sm:$0xff]  ;;  %v30_v2 = vld [vmem:[%s228_s0 + $0x8] sm:$0xff]  ;;  %v12_v14 = vstv %s233_s6 }
   0x2   :  { %v29_v1 = vld [vmem:[%s228_s0] sm:$0xff]  ;;  %55 = vmatpush.bf16.msra.mxu0 %v144_v0  ;;  %v146_v4 = vld [vmem:[%s231_s3 + $0x8] sm:$0xff]  ;;  %13 = vst [vmem:[#allocation2] sm:$0x1] %v12_v14 }
   0x3   :  { %v31_v3 = vpack.c.bf16 %v30_v2, %v29_v1  ;;  %95 = vmatpush.bf16.msra.mxu1 %v146_v4  ;;  %v145_v5 = vld [vmem:[%s231_s3] sm:$0xff] }
   0x4   :  { %v147_v7 = vld [vmem:[%s229_s2] ss:$0 sm:$0xff] }
   0x5   :  { %134 = vmatmul.msk.bf16.vlgmr.msra.gmra.mxu0 %vm44_vm0, %v31_v3  ;;  %v148_v15 = vld [vmem:[%s230_s4] ss:$0 sm:$0xff] }
   0x6   :  { %v149_v18 = vld [vmem:[%s232_s5] ss:$0 sm:$0xff] }
   0x7   :  { %96 = vmatpush.bf16.msra.mxu1 %v145_v5 }
   0x9   :  { %v150_v27 = vld [vmem:[#allocation2] ss:$0 sm:$0xff] }
  0x82   :  { %v57_v6 = vpop.f32.mrf.mxu0 }
  0x83   :  { %v58_v8 = vadd.f32 %v147_v7, %v57_v6 }
  0x85   :  { %v62_v11 = vmax.f32 %v58_v8, 0.0 }
  0x8a   :  { %v59_v9 = vpop.f32.mrf.mxu0 }
  0x8b   :  { %v60_v10 = vadd.f32 %v147_v7, %v59_v9 }
  0x8d   :  { %v63_v12 = vmax.f32 %v60_v10, 0.0 }
  0x8f   :  { %v64_v13 = vpack.c.bf16 %v63_v12, %v62_v11 }
  0x91   :  { %143 = vmatmul.msk.bf16.vlgmr.msra.gmra.mxu1 %vm85_vm1, %v64_v13 }
 0x10e   :  { %v98_v16 = vpop.f32.mrf.mxu1 }
 0x10f   :  { %v99_v17 = vadd.f32 %v148_v15, %v98_v16 }
 0x111   :  { %v103_v19 = vmax.f32 %v99_v17, 0.0 }
 0x113   :  { %v109_v20 = vmul.f32 %v149_v18, %v103_v19 }
 0x115   :  { %v111_v21 = vsel %vm85_vm1, %v109_v20, 0.0 }
 0x116   :  { %v100_v22 = vpop.f32.mrf.mxu1  ;;  %112 = vadd.xlane.f32.xlu0 %v111_v21 }
 0x117   :  { %v101_v23 = vadd.f32 %v148_v15, %v100_v22 }
 0x119   :  { %v104_v24 = vmax.f32 %v101_v23, 0.0 }
 0x11b   :  { %v110_v25 = vmul.f32 %v149_v18, %v104_v24 }
 0x11d   :  { %v114_v26 = vsel %vm85_vm1, %v110_v25, 0.0 }
 0x11e   :  { %115 = vadd.xlane.f32.xlu0 %v114_v26 }
 0x189   :  { %v113_v28 = vpop.xlane.xlu0 %112 }
 0x18a   :  { %v121_v29 = vadd.f32 %v150_v27, %v113_v28 }
 0x18c   :  { %124 = vst.msk [vmem:[%s234_s7] sm:$0xff] %vm123_vm2, %v121_v29 }
 0x191   :  { %v116_v30 = vpop.xlane.xlu0 %115 }
 0x192   :  { %v122_v31 = vadd.f32 %v150_v27, %v116_v30 }
 0x194   :  { %125 = vst.msk [vmem:[%s234_s7 + $0x8] sm:$0xff] %vm123_vm2, %v122_v31 }

</bundles_post_ra>
